<compile_context>
chip_gen: v7x
topology: tpu7x:2x2x1
jax: 0.10.0
libtpu: 0.0.40
codegen_flags: <defaults>
</compile_context>

<pallas_src>
import functools

import jax
import jax.numpy as jnp
from jax.experimental import pallas as pl
from jax.experimental.pallas import tpu as pltpu


def _log_sigmoid(x):
    # Numerically stable log(sigmoid(x)) = min(x, 0) - log1p(exp(-|x|)).
    return jnp.minimum(x, 0.0) - jnp.log1p(jnp.exp(-jnp.abs(x)))


def _deepwalk_sgns_kernel(in_tbl_ref, out_tbl_ref, tgt_ref, ctx_ref, neg_ref,
                          loss_ref, *, batch):
    # in_tbl_ref / out_tbl_ref : [D, V]  full embedding tables (VMEM-resident;
    #                                    constant index_map -> DMA'd once).
    # tgt_ref / ctx_ref        : [1, TB] int32 vertex ids (lane-dense).
    # neg_ref                  : [N, TB] int32 negative-sample ids.
    # loss_ref                 : [1, TB] f32 per-example NLL (0 on padded lanes).
    D, V = in_tbl_ref.shape
    N, TB = neg_ref.shape

    in_tbl = in_tbl_ref[...]        # [D, V] f32
    out_tbl = out_tbl_ref[...]      # [D, V] f32

    # Hoist the iota once (JAX does not CSE broadcast_in_dim).
    vocab_iota = jax.lax.broadcasted_iota(jnp.int32, (V, TB), 0)

    def gather_cols(tbl, idx_row):                            # idx_row: [1, TB]
        onehot = (vocab_iota == idx_row).astype(tbl.dtype)    # [V, TB]
        # One-hot gather on the MXU (exact: 1.0 * value), f32 accumulation.
        return jnp.dot(tbl, onehot, preferred_element_type=jnp.float32)  # [D, TB]

    u = gather_cols(in_tbl, tgt_ref[...])                     # [D, TB]
    v = gather_cols(out_tbl, ctx_ref[...])                    # [D, TB]

    # Euclidean dot: D is the sublane axis -> cheap sublane reduce (XLU).
    pos_score = jnp.sum(u * v, axis=0, keepdims=True)         # [1, TB]
    nll = -_log_sigmoid(pos_score)                            # [1, TB]

    # Stream negatives one at a time; N is small and static -> fully unrolled.
    for t in range(N):
        neg_vec = gather_cols(out_tbl, neg_ref[pl.ds(t, 1), :])      # [D, TB]
        neg_score = jnp.sum(u * neg_vec, axis=0, keepdims=True)      # [1, TB]
        nll = nll - _log_sigmoid(-neg_score)

    # Zero padded lanes so any downstream full-width reduction stays unbiased.
    lane = jax.lax.broadcasted_iota(jnp.int32, (1, TB), 1)
    valid = (pl.program_id(0) * TB + lane) < batch
    loss_ref[...] = jnp.where(valid, nll, 0.0)


def deepwalk_forward(input_embed, output_embed, target, context, negatives,
                     *, tile_b=None):
    """Scalar NLL of the skip-gram negative-sampling (DeepWalk) model."""
    target = jnp.asarray(target).reshape(-1)
    context = jnp.asarray(context).reshape(-1)
    negatives = jnp.asarray(negatives)
    B = target.shape[0]
    N = negatives.shape[1]
    V, D = input_embed.shape

    # Lane-dense tiling: batch -> lanes.  Aim for >= 2 grid iterations (so the
    # "parallel" axis can shard across v7x's two TensorCores) while capping the
    # tile well below every generation's VMEM budget.
    if tile_b is None:
        b_pad128 = max(128, ((B + 127) // 128) * 128)
        half = (b_pad128 // 2) // 128 * 128
        tile_b = max(128, min(4096, half))
    assert tile_b % 128 == 0, "tile_b must be a multiple of 128 (lane width)"
    B_pad = ((B + tile_b - 1) // tile_b) * tile_b
    pad = B_pad - B

    # Only int32 ids and the small tables cross HBM: gathers are fused into the
    # kernel, so the [B, N, D] negatives slab is never materialized/transposed.
    in_tblT = input_embed.T                                            # [D, V]
    out_tblT = output_embed.T                                          # [D, V]
    tgt = jnp.pad(target.astype(jnp.int32).reshape(1, B), ((0, 0), (0, pad)))
    ctx = jnp.pad(context.astype(jnp.int32).reshape(1, B), ((0, 0), (0, pad)))
    neg = jnp.pad(negatives.astype(jnp.int32).T, ((0, 0), (0, pad)))   # [N, B_pad]

    grid = (B_pad // tile_b,)
    kernel = functools.partial(_deepwalk_sgns_kernel, batch=B)

    per_example_nll = pl.pallas_call(
        kernel,
        out_shape=jax.ShapeDtypeStruct((1, B_pad), jnp.float32),
        grid_spec=pltpu.PrefetchScalarGridSpec(
            num_scalar_prefetch=0,
            grid=grid,
            in_specs=[
                pl.BlockSpec((D, V), lambda i: (0, 0)),       # input table (resident)
                pl.BlockSpec((D, V), lambda i: (0, 0)),       # output table (resident)
                pl.BlockSpec((1, tile_b), lambda i: (0, i)),  # target ids
                pl.BlockSpec((1, tile_b), lambda i: (0, i)),  # context ids
                pl.BlockSpec((N, tile_b), lambda i: (0, i)),  # negative ids
            ],
            out_specs=pl.BlockSpec((1, tile_b), lambda i: (0, i)),
        ),
        compiler_params=pltpu.CompilerParams(
            dimension_semantics=("parallel",),
            vmem_limit_bytes=32 * 1024 * 1024),
    )(in_tblT, out_tblT, tgt, ctx, neg)

    # Padded lanes were zeroed in-kernel -> plain full-width mean over real B.
    return jnp.sum(per_example_nll) / jnp.float32(B)


if __name__ == "__main__":
    key = jax.random.PRNGKey(0)
    n_vertices = 64
    embedding_dim = 16   # module default is 5; 16 keeps D sublane-friendly & small
    B, n_negs = 16, 4

    k1, k2, k3, k4, k5 = jax.random.split(key, 5)
    # nn.Embedding default init: N(0, 1), deterministic here via PRNGKey(0).
    input_embed = jax.random.normal(k1, (n_vertices, embedding_dim), jnp.float32)
    output_embed = jax.random.normal(k2, (n_vertices, embedding_dim), jnp.float32)

    target = jax.random.randint(k3, (B, 1), 0, n_vertices, dtype=jnp.int32)
    context = jax.random.randint(k4, (B, 1), 0, n_vertices, dtype=jnp.int32)
    negatives = jax.random.randint(k5, (B, n_negs), 0, n_vertices, dtype=jnp.int32)

    loss = deepwalk_forward(input_embed, output_embed, target, context, negatives)
    jax.block_until_ready(loss)
    print("KERNEL_OK")
</pallas_src>

<mosaic_0001>
module attributes {stable_mosaic.version = 11 : i64} {
  func.func @_deepwalk_sgns_kernel(%arg0: i32, %arg1: memref<16x64xf32, #tpu.memory_space<vmem>>, %arg2: memref<16x64xf32, #tpu.memory_space<vmem>>, %arg3: memref<1x128xi32, #tpu.memory_space<vmem>>, %arg4: memref<1x128xi32, #tpu.memory_space<vmem>>, %arg5: memref<4x128xi32, #tpu.memory_space<vmem>>, %arg6: memref<1x128xf32, #tpu.memory_space<vmem>>) attributes {dimension_semantics = [#tpu.dimension_semantics<parallel>], iteration_bounds = array<i64: 1>, scalar_prefetch = 0 : i64, scratch_operands = 0 : i64, tpu.core_type = #tpu.core_type<tc>, window_params = [{pipeline_mode = #tpu.pipeline_mode<synchronous>, transform_indices = @transform_0, window_bounds = array<i64: 16, 64>}, {pipeline_mode = #tpu.pipeline_mode<synchronous>, transform_indices = @transform_1, window_bounds = array<i64: 16, 64>}, {transform_indices = @transform_2, window_bounds = array<i64: 1, 128>}, {transform_indices = @transform_3, window_bounds = array<i64: 1, 128>}, {transform_indices = @transform_4, window_bounds = array<i64: 4, 128>}, {transform_indices = @transform_5, window_bounds = array<i64: 1, 128>}]} {
    %c0 = arith.constant 0 : index
    %c0_0 = arith.constant 0 : index
    %0 = vector.load %arg1[%c0, %c0_0] : memref<16x64xf32, #tpu.memory_space<vmem>>, vector<16x64xf32>
    %c0_1 = arith.constant 0 : index
    %c0_2 = arith.constant 0 : index
    %1 = vector.load %arg2[%c0_1, %c0_2] : memref<16x64xf32, #tpu.memory_space<vmem>>, vector<16x64xf32>
    %2 = tpu.iota {dimensions = array<i32: 0>} : vector<64x128xi32>
    %c0_3 = arith.constant 0 : index
    %c0_4 = arith.constant 0 : index
    %3 = vector.load %arg3[%c0_3, %c0_4] : memref<1x128xi32, #tpu.memory_space<vmem>>, vector<1x128xi32>
    %4 = vector.broadcast %3 : vector<1x128xi32> to vector<64x128xi32>
    %5 = arith.cmpi eq, %2, %4 : vector<64x128xi32>
    %6 = arith.extui %5 : vector<64x128xi1> to vector<64x128xi32>
    %7 = arith.sitofp %6 : vector<64x128xi32> to vector<64x128xf32>
    %cst = arith.constant dense<0.000000e+00> : vector<16x128xf32>
    %8 = tpu.matmul %0, %7, %cst {dimension_numbers = #tpu.dot_dimension_numbers<[1], [0], [0], [1], [0, 0, 1, 1], [], []>} : vector<16x64xf32>, vector<64x128xf32>, vector<16x128xf32> -> vector<16x128xf32>
    %c0_5 = arith.constant 0 : index
    %c0_6 = arith.constant 0 : index
    %9 = vector.load %arg4[%c0_5, %c0_6] : memref<1x128xi32, #tpu.memory_space<vmem>>, vector<1x128xi32>
    %10 = vector.broadcast %9 : vector<1x128xi32> to vector<64x128xi32>
    %11 = arith.cmpi eq, %2, %10 : vector<64x128xi32>
    %12 = arith.extui %11 : vector<64x128xi1> to vector<64x128xi32>
    %13 = arith.sitofp %12 : vector<64x128xi32> to vector<64x128xf32>
    %cst_7 = arith.constant dense<0.000000e+00> : vector<16x128xf32>
    %14 = tpu.matmul %1, %13, %cst_7 {dimension_numbers = #tpu.dot_dimension_numbers<[1], [0], [0], [1], [0, 0, 1, 1], [], []>} : vector<16x64xf32>, vector<64x128xf32>, vector<16x128xf32> -> vector<16x128xf32>
    %15 = arith.mulf %8, %14 : vector<16x128xf32>
    %cst_8 = arith.constant dense<0.000000e+00> : vector<128xf32>
    %16 = vector.multi_reduction <add>, %15, %cst_8 [0] : vector<16x128xf32> to vector<128xf32>
    %17 = vector.shape_cast %16 : vector<128xf32> to vector<1x128xf32>
    %cst_9 = arith.constant 0.000000e+00 : f32
    %18 = vector.broadcast %cst_9 : f32 to vector<1x128xf32>
    %19 = arith.minimumf %17, %18 : vector<1x128xf32>
    %20 = math.absf %17 : vector<1x128xf32>
    %cst_10 = arith.constant 0.000000e+00 : f32
    %21 = vector.broadcast %cst_10 : f32 to vector<1x128xf32>
    %22 = arith.subf %21, %20 : vector<1x128xf32>
    %23 = math.exp %22 : vector<1x128xf32>
    %24 = math.log1p %23 : vector<1x128xf32>
    %25 = arith.subf %19, %24 : vector<1x128xf32>
    %cst_11 = arith.constant 0.000000e+00 : f32
    %26 = vector.broadcast %cst_11 : f32 to vector<1x128xf32>
    %27 = arith.subf %26, %25 : vector<1x128xf32>
    %c0_12 = arith.constant 0 : index
    %c0_13 = arith.constant 0 : index
    %28 = vector.load %arg5[%c0_12, %c0_13] : memref<4x128xi32, #tpu.memory_space<vmem>>, vector<1x128xi32>
    %29 = vector.broadcast %28 : vector<1x128xi32> to vector<64x128xi32>
    %30 = arith.cmpi eq, %2, %29 : vector<64x128xi32>
    %31 = arith.extui %30 : vector<64x128xi1> to vector<64x128xi32>
    %32 = arith.sitofp %31 : vector<64x128xi32> to vector<64x128xf32>
    %cst_14 = arith.constant dense<0.000000e+00> : vector<16x128xf32>
    %33 = tpu.matmul %1, %32, %cst_14 {dimension_numbers = #tpu.dot_dimension_numbers<[1], [0], [0], [1], [0, 0, 1, 1], [], []>} : vector<16x64xf32>, vector<64x128xf32>, vector<16x128xf32> -> vector<16x128xf32>
    %34 = arith.mulf %8, %33 : vector<16x128xf32>
    %cst_15 = arith.constant dense<0.000000e+00> : vector<128xf32>
    %35 = vector.multi_reduction <add>, %34, %cst_15 [0] : vector<16x128xf32> to vector<128xf32>
    %36 = vector.shape_cast %35 : vector<128xf32> to vector<1x128xf32>
    %cst_16 = arith.constant 0.000000e+00 : f32
    %37 = vector.broadcast %cst_16 : f32 to vector<1x128xf32>
    %38 = arith.subf %37, %36 : vector<1x128xf32>
    %cst_17 = arith.constant 0.000000e+00 : f32
    %39 = vector.broadcast %cst_17 : f32 to vector<1x128xf32>
    %40 = arith.minimumf %38, %39 : vector<1x128xf32>
    %41 = math.absf %38 : vector<1x128xf32>
    %cst_18 = arith.constant 0.000000e+00 : f32
    %42 = vector.broadcast %cst_18 : f32 to vector<1x128xf32>
    %43 = arith.subf %42, %41 : vector<1x128xf32>
    %44 = math.exp %43 : vector<1x128xf32>
    %45 = math.log1p %44 : vector<1x128xf32>
    %46 = arith.subf %40, %45 : vector<1x128xf32>
    %47 = arith.subf %27, %46 : vector<1x128xf32>
    %c1 = arith.constant 1 : index
    %c0_19 = arith.constant 0 : index
    %48 = vector.load %arg5[%c1, %c0_19] : memref<4x128xi32, #tpu.memory_space<vmem>>, vector<1x128xi32>
    %49 = vector.broadcast %48 : vector<1x128xi32> to vector<64x128xi32>
    %50 = arith.cmpi eq, %2, %49 : vector<64x128xi32>
    %51 = arith.extui %50 : vector<64x128xi1> to vector<64x128xi32>
    %52 = arith.sitofp %51 : vector<64x128xi32> to vector<64x128xf32>
    %cst_20 = arith.constant dense<0.000000e+00> : vector<16x128xf32>
    %53 = tpu.matmul %1, %52, %cst_20 {dimension_numbers = #tpu.dot_dimension_numbers<[1], [0], [0], [1], [0, 0, 1, 1], [], []>} : vector<16x64xf32>, vector<64x128xf32>, vector<16x128xf32> -> vector<16x128xf32>
    %54 = arith.mulf %8, %53 : vector<16x128xf32>
    %cst_21 = arith.constant dense<0.000000e+00> : vector<128xf32>
    %55 = vector.multi_reduction <add>, %54, %cst_21 [0] : vector<16x128xf32> to vector<128xf32>
    %56 = vector.shape_cast %55 : vector<128xf32> to vector<1x128xf32>
    %cst_22 = arith.constant 0.000000e+00 : f32
    %57 = vector.broadcast %cst_22 : f32 to vector<1x128xf32>
    %58 = arith.subf %57, %56 : vector<1x128xf32>
    %cst_23 = arith.constant 0.000000e+00 : f32
    %59 = vector.broadcast %cst_23 : f32 to vector<1x128xf32>
    %60 = arith.minimumf %58, %59 : vector<1x128xf32>
    %61 = math.absf %58 : vector<1x128xf32>
    %cst_24 = arith.constant 0.000000e+00 : f32
    %62 = vector.broadcast %cst_24 : f32 to vector<1x128xf32>
    %63 = arith.subf %62, %61 : vector<1x128xf32>
    %64 = math.exp %63 : vector<1x128xf32>
    %65 = math.log1p %64 : vector<1x128xf32>
    %66 = arith.subf %60, %65 : vector<1x128xf32>
    %67 = arith.subf %47, %66 : vector<1x128xf32>
    %c2 = arith.constant 2 : index
    %c0_25 = arith.constant 0 : index
    %68 = vector.load %arg5[%c2, %c0_25] : memref<4x128xi32, #tpu.memory_space<vmem>>, vector<1x128xi32>
    %69 = vector.broadcast %68 : vector<1x128xi32> to vector<64x128xi32>
    %70 = arith.cmpi eq, %2, %69 : vector<64x128xi32>
    %71 = arith.extui %70 : vector<64x128xi1> to vector<64x128xi32>
    %72 = arith.sitofp %71 : vector<64x128xi32> to vector<64x128xf32>
    %cst_26 = arith.constant dense<0.000000e+00> : vector<16x128xf32>
    %73 = tpu.matmul %1, %72, %cst_26 {dimension_numbers = #tpu.dot_dimension_numbers<[1], [0], [0], [1], [0, 0, 1, 1], [], []>} : vector<16x64xf32>, vector<64x128xf32>, vector<16x128xf32> -> vector<16x128xf32>
    %74 = arith.mulf %8, %73 : vector<16x128xf32>
    %cst_27 = arith.constant dense<0.000000e+00> : vector<128xf32>
    %75 = vector.multi_reduction <add>, %74, %cst_27 [0] : vector<16x128xf32> to vector<128xf32>
    %76 = vector.shape_cast %75 : vector<128xf32> to vector<1x128xf32>
    %cst_28 = arith.constant 0.000000e+00 : f32
    %77 = vector.broadcast %cst_28 : f32 to vector<1x128xf32>
    %78 = arith.subf %77, %76 : vector<1x128xf32>
    %cst_29 = arith.constant 0.000000e+00 : f32
    %79 = vector.broadcast %cst_29 : f32 to vector<1x128xf32>
    %80 = arith.minimumf %78, %79 : vector<1x128xf32>
    %81 = math.absf %78 : vector<1x128xf32>
    %cst_30 = arith.constant 0.000000e+00 : f32
    %82 = vector.broadcast %cst_30 : f32 to vector<1x128xf32>
    %83 = arith.subf %82, %81 : vector<1x128xf32>
    %84 = math.exp %83 : vector<1x128xf32>
    %85 = math.log1p %84 : vector<1x128xf32>
    %86 = arith.subf %80, %85 : vector<1x128xf32>
    %87 = arith.subf %67, %86 : vector<1x128xf32>
    %c3 = arith.constant 3 : index
    %c0_31 = arith.constant 0 : index
    %88 = vector.load %arg5[%c3, %c0_31] : memref<4x128xi32, #tpu.memory_space<vmem>>, vector<1x128xi32>
    %89 = vector.broadcast %88 : vector<1x128xi32> to vector<64x128xi32>
    %90 = arith.cmpi eq, %2, %89 : vector<64x128xi32>
    %91 = arith.extui %90 : vector<64x128xi1> to vector<64x128xi32>
    %92 = arith.sitofp %91 : vector<64x128xi32> to vector<64x128xf32>
    %cst_32 = arith.constant dense<0.000000e+00> : vector<16x128xf32>
    %93 = tpu.matmul %1, %92, %cst_32 {dimension_numbers = #tpu.dot_dimension_numbers<[1], [0], [0], [1], [0, 0, 1, 1], [], []>} : vector<16x64xf32>, vector<64x128xf32>, vector<16x128xf32> -> vector<16x128xf32>
    %94 = arith.mulf %8, %93 : vector<16x128xf32>
    %cst_33 = arith.constant dense<0.000000e+00> : vector<128xf32>
    %95 = vector.multi_reduction <add>, %94, %cst_33 [0] : vector<16x128xf32> to vector<128xf32>
    %96 = vector.shape_cast %95 : vector<128xf32> to vector<1x128xf32>
    %cst_34 = arith.constant 0.000000e+00 : f32
    %97 = vector.broadcast %cst_34 : f32 to vector<1x128xf32>
    %98 = arith.subf %97, %96 : vector<1x128xf32>
    %cst_35 = arith.constant 0.000000e+00 : f32
    %99 = vector.broadcast %cst_35 : f32 to vector<1x128xf32>
    %100 = arith.minimumf %98, %99 : vector<1x128xf32>
    %101 = math.absf %98 : vector<1x128xf32>
    %cst_36 = arith.constant 0.000000e+00 : f32
    %102 = vector.broadcast %cst_36 : f32 to vector<1x128xf32>
    %103 = arith.subf %102, %101 : vector<1x128xf32>
    %104 = math.exp %103 : vector<1x128xf32>
    %105 = math.log1p %104 : vector<1x128xf32>
    %106 = arith.subf %100, %105 : vector<1x128xf32>
    %107 = arith.subf %87, %106 : vector<1x128xf32>
    %108 = tpu.iota {dimensions = array<i32: 1>} : vector<1x128xi32>
    %c128_i32 = arith.constant 128 : i32
    %109 = arith.muli %arg0, %c128_i32 : i32
    %110 = vector.broadcast %109 : i32 to vector<1x128xi32>
    %111 = arith.addi %110, %108 : vector<1x128xi32>
    %c16_i32 = arith.constant 16 : i32
    %112 = vector.broadcast %c16_i32 : i32 to vector<1x128xi32>
    %113 = arith.cmpi slt, %111, %112 : vector<1x128xi32>
    %cst_37 = arith.constant 0.000000e+00 : f32
    %114 = vector.broadcast %cst_37 : f32 to vector<1x128xf32>
    %115 = arith.select %113, %107, %114 : vector<1x128xi1>, vector<1x128xf32>
    %c0_38 = arith.constant 0 : index
    %c0_39 = arith.constant 0 : index
    %116 = vector.load %arg6[%c0_38, %c0_39] : memref<1x128xf32, #tpu.memory_space<vmem>>, vector<1x128xf32>
    tpu.vector_store %arg6[%c0_38, %c0_39], %115 {strides = array<i32>} : memref<1x128xf32, #tpu.memory_space<vmem>>, vector<1x128xf32>,
    return
  }
  func.func @transform_0(%arg0: i32) -> (i32, i32) {
    %c0_i32 = arith.constant 0 : i32
    %c0_i32_0 = arith.constant 0 : i32
    %c0_i32_1 = arith.constant 0 : i32
    return %c0_i32, %c0_i32_0 : i32, i32
  }
  func.func @transform_1(%arg0: i32) -> (i32, i32) {
    %c0_i32 = arith.constant 0 : i32
    %c0_i32_0 = arith.constant 0 : i32
    %c0_i32_1 = arith.constant 0 : i32
    return %c0_i32, %c0_i32_0 : i32, i32
  }
  func.func @transform_2(%arg0: i32) -> (i32, i32) {
    %c0_i32 = arith.constant 0 : i32
    %c0_i32_0 = arith.constant 0 : i32
    return %c0_i32, %arg0 : i32, i32
  }
  func.func @transform_3(%arg0: i32) -> (i32, i32) {
    %c0_i32 = arith.constant 0 : i32
    %c0_i32_0 = arith.constant 0 : i32
    return %c0_i32, %arg0 : i32, i32
  }
  func.func @transform_4(%arg0: i32) -> (i32, i32) {
    %c0_i32 = arith.constant 0 : i32
    %c0_i32_0 = arith.constant 0 : i32
    return %c0_i32, %arg0 : i32, i32
  }
  func.func @transform_5(%arg0: i32) -> (i32, i32) {
    %c0_i32 = arith.constant 0 : i32
    %c0_i32_0 = arith.constant 0 : i32
    return %c0_i32, %arg0 : i32, i32
  }
}

</mosaic_0001>

<bundles_post_ra>
// kernel: tpu_custom_call.1
= control target key start
LH: loop header
LB: loop body
LE: loop exit
PB: predicated region body
PF: predicated region fallthrough
CT: control target
= control target key end

     0   :  { %10 = vsyncpa [#allocation3], 0  ;;  %s1719_s0 = inlined_call_operand.hbm [shape: f32[16,64], index: 0, kind: input, shape index: {}]   ;;  %s1720_s1 = inlined_call_operand.hbm [shape: f32[16,64], index: 1, kind: input, shape index: {}]   ;;  %s1721_s2 = inlined_call_operand.vmem [shape: s32[1,128], index: 2, kind: input, shape index: {}]   ;;  %s1722_s3 = inlined_call_operand.vmem [shape: s32[1,128], index: 3, kind: input, shape index: {}]   ;;  %s1723_s4 = inlined_call_operand.vmem [shape: s32[4,128], index: 4, kind: input, shape index: {}]   ;;  %s1724_s5 = inlined_call_operand.hbm [shape: f32[1,128], index: 5, kind: output, shape index: {}]  }
   0x1   :  { %11 = vsyncpa [#allocation6], 0 }
   0x2   :  { %12 = vsyncpa [#allocation4], 0  ;;  %s1334_s18 = smov [#allocation2]   ;;  %s1262_s22 = scalar_lea.hbm %s1719_s0, 256 }
   0x3   :  { %s18_s19 = sshll.u32 %s1334_s18, 4  ;;  %p1263_p0 = scmp.ne.s32.totalorder %s1719_s0, %s1262_s22  ;;  %s19_s19 = int_to_ptr.vmem [resolvable:$true] %s18_s19 }
   0x4   :  { %p1266_p1 = scmp.lt.u32.totalorder %s1262_s22, %s1719_s0 }
   0x6   :  { %p1268_p2 = pnand %p1266_p1, %p1263_p0 }
   0x8   :  { %1271 = shalt.err (!%p1268_p2)
}
   0x9   :  { %s1272_s27 = scalar_lea.vmem %s19_s19, 256  ;;  %p1277_p4 = scmp.lt.s32.totalorder %s19_s19, %s19_s19 }
   0xa   :  { %p1273_p3 = scmp.ne.s32.totalorder %s19_s19, %s1272_s27  ;;  %p1278_p5 = scmp.lt.s32.totalorder %s1272_s27, %s1272_s27 }
   0xc   :  { %p1279_p6 = por %p1278_p5, %p1277_p4 }
   0xe   :  { %p1280_p7 = pnand %p1279_p6, %p1273_p3 }
  0x10   :  { %1283 = shalt.err (!%p1280_p7)
}
  0x11   :  { %s1335_s28 = smov 128   ;;  %s1336_s29 = smov 8  }
  0x12   :  { %24 = dma.hbm_to_vmem [thread:$0]  %s1719_s0, 256, %s19_s19, [#allocation3], %s1335_s28, %s1335_s28, %s1336_s29  }
  0x13   :  { %s1337_s7 = smov [#allocation5]   ;;  %s1284_s11 = scalar_lea.hbm %s1720_s1, 256 }
  0x14   :  { %s30_s8 = sshll.u32 %s1337_s7, 4  ;;  %p1285_p8 = scmp.ne.s32.totalorder %s1720_s1, %s1284_s11  ;;  %s31_s8 = int_to_ptr.vmem [resolvable:$true] %s30_s8 }
  0x15   :  { %p1288_p9 = scmp.lt.u32.totalorder %s1284_s11, %s1720_s1 }
  0x17   :  { %p1290_p10 = pnand %p1288_p9, %p1285_p8 }
  0x19   :  { %1293 = shalt.err (!%p1290_p10)
}
  0x1a   :  { %s1294_s16 = scalar_lea.vmem %s31_s8, 256  ;;  %p1299_p12 = scmp.lt.s32.totalorder %s31_s8, %s31_s8 }
  0x1b   :  { %p1295_p11 = scmp.ne.s32.totalorder %s31_s8, %s1294_s16  ;;  %p1300_p13 = scmp.lt.s32.totalorder %s1294_s16, %s1294_s16 }
  0x1d   :  { %p1301_p0 = por %p1300_p13, %p1299_p12 }
  0x1f   :  { %p1302_p1 = pnand %p1301_p0, %p1295_p11 }
  0x21   :  { %1305 = shalt.err (!%p1302_p1)
}
  0x22   :  { %36 = dma.hbm_to_vmem [thread:$0]  %s1720_s1, 256, %s31_s8, [#allocation6], %s1335_s28, %s1335_s28, %s1336_s29  }
  0x23   :  { %1328 = dma.done.wait [#allocation3], 256  }
  0x24   :  { %1329 = vsyncadd [#allocation3], 4294967040 }
  0x25   :  { %1330 = dma.done.wait [#allocation6], 256  }
  0x26   :  { %1331 = vsyncadd [#allocation6], 4294967040  ;;  %v53_v0 = vlaneseq  ;;  %vm91_vm0 = vcmask 523264   ;;  %v852_v7 = vld [vmem:[%s1721_s2] ss:$0 sm:$0xff]  ;;  %v1423_v10 = vld [vmem:[#allocation5] sm:$0xff] }
  0x27   :  { %v871_v8 = vld [vmem:[%s1722_s3] ss:$0 sm:$0xff]  ;;  %1061 = vmatprep.mubr.msk.f32.mxu1 %vm91_vm0, %v1423_v10  ;;  %v1338_v11 = vmov 1.0|1.0   ;;  %v909_v17 = vld [vmem:[%s1723_s4 + $0x1] ss:$0 sm:$0xff] }
  0x28   :  { %v1395_v1 = vshrl.u32 %v53_v0, 7  ;;  %v49_v9 = vld [vmem:[#allocation2] sm:$0xff]  ;;  %v50_v21 = vld [vmem:[#allocation2 + $0x8] sm:$0xff]  ;;  %v1511_v22 = vld [vmem:[#allocation5 + $0x8] sm:$0xff] }
  0x29   :  { %1042 = vmatprep.mubr.msk.f32.mxu0 %vm91_vm0, %v49_v9  ;;  %v890_v16 = vld [vmem:[%s1723_s4] ss:$0 sm:$0xff]  ;;  %v928_v27 = vld [vmem:[%s1723_s4 + $0x2] ss:$0 sm:$0xff]  ;;  %v947_v28 = vld [vmem:[%s1723_s4 + $0x3] ss:$0 sm:$0xff] }
  0x2a   :  { %v1398_v2 = vadd.s32 8, %v1395_v1  ;;  %v1401_v3 = vadd.s32 16, %v1395_v1  ;;  %v1404_v4 = vadd.s32 24, %v1395_v1  ;;  %v1407_v5 = vadd.s32 32, %v1395_v1  ;;  %s1339_s4 = smov [#allocation7]  }
  0x2b   :  { %v1410_v6 = vadd.s32 40, %v1395_v1  ;;  %vm67_vm1 = vcmp.eq.s32.totalorder %v1395_v1, %v852_v7  ;;  %vm178_vm3 = vcmp.eq.s32.totalorder %v1395_v1, %v871_v8  ;;  %v1435_v12 = vadd.s32 48, %v1395_v1  ;;  %s842_s27 = sshll.u32 %s1339_s4, 4  ;;  %s843_s27 = int_to_ptr.vmem [resolvable:$true] %s842_s27 }
  0x2c   :  { %vm68_vm2 = vcmp.eq.s32.totalorder %v1398_v2, %v852_v7  ;;  %vm179_vm4 = vcmp.eq.s32.totalorder %v1398_v2, %v871_v8  ;;  %vm69_vm6 = vcmp.eq.s32.totalorder %v1401_v3, %v852_v7  ;;  %vm70_vm7 = vcmp.eq.s32.totalorder %v1404_v4, %v852_v7  ;;  %s1306_s28 = scalar_lea.vmem %s843_s27, 16  ;;  %s1310_s29 = scalar_lea.vmem %s843_s27, 32 }
  0x2d   :  { %vm1140_vm5 = vmpackc.low %vm68_vm2, %vm67_vm1  ;;  %vm180_vm8 = vcmp.eq.s32.totalorder %v1401_v3, %v871_v8  ;;  %vm181_vm9 = vcmp.eq.s32.totalorder %v1404_v4, %v871_v8  ;;  %vm71_vm11 = vcmp.eq.s32.totalorder %v1407_v5, %v852_v7  ;;  %vm72_vm12 = vcmp.eq.s32.totalorder %v1410_v6, %v852_v7  ;;  %p1307_p2 = scmp.ne.s32.totalorder %s843_s27, %s1306_s28  ;;  %p1311_p3 = scmp.lt.s32.totalorder %s843_s27, %s843_s27 }
  0x2e   :  { %1141 = vmatprep.subr.msk.bf16.mxu0 %vm1140_vm5, %v1338_v11  ;;  %vm1156_vm10 = vmpackc.low %vm179_vm4, %vm178_vm3  ;;  %v1438_v13 = vadd.s32 56, %v1395_v1  ;;  %vm182_vm14 = vcmp.eq.s32.totalorder %v1407_v5, %v871_v8  ;;  %vm183_vm15 = vcmp.eq.s32.totalorder %v1410_v6, %v871_v8  ;;  %vm73_vm4 = vcmp.eq.s32.totalorder %v1435_v12, %v852_v7  ;;  %p1312_p4 = scmp.lt.s32.totalorder %s1310_s29, %s1306_s28 }
  0x2f   :  { %1157 = vmatprep.subr.msk.bf16.mxu1 %vm1156_vm10, %v1338_v11  ;;  %1143 = vmatpush3.bf16.msk.msra.mxu0 %vm1140_vm5, %v1338_v11  ;;  %vm1144_vm13 = vmpackc.low %vm70_vm7, %vm69_vm6  ;;  %vm184_vm6 = vcmp.eq.s32.totalorder %v1435_v12, %v871_v8 }
  0x30   :  { %1159 = vmatpush3.bf16.msk.msra.mxu1 %vm1156_vm10, %v1338_v11  ;;  %1145 = vmatprep.subr.msk.bf16.mxu0 %vm1144_vm13, %v1338_v11  ;;  %vm1160_vm1 = vmpackc.low %vm181_vm9, %vm180_vm8  ;;  %vm74_vm5 = vcmp.eq.s32.totalorder %v1438_v13, %v852_v7  ;;  %vm185_vm7 = vcmp.eq.s32.totalorder %v1438_v13, %v871_v8  ;;  %vm313_vm10 = vcmp.eq.s32.totalorder %v1395_v1, %v890_v16  ;;  %p1313_p5 = por %p1312_p4, %p1311_p3 }
  0x31   :  { %1161 = vmatprep.subr.msk.bf16.mxu1 %vm1160_vm1, %v1338_v11  ;;  %vm1451_vm2 = vmpackc.low %vm72_vm12, %vm71_vm11  ;;  %vm314_vm11 = vcmp.eq.s32.totalorder %v1398_v2, %v890_v16  ;;  %vm443_vm12 = vcmp.eq.s32.totalorder %v1395_v1, %v909_v17 }
  0x32   :  { %vm1455_vm3 = vmpackc.low %vm183_vm15, %vm182_vm14  ;;  %p1314_p6 = pnand %p1313_p5, %p1307_p2 }
  0x33   :  { %1147 = vmatpush3.bf16.msk.msra.mxu0 %vm1144_vm13, %v1338_v11  ;;  %vm1152_vm8 = vmpackc.low %vm74_vm5, %vm73_vm4  ;;  %vm444_vm13 = vcmp.eq.s32.totalorder %v1398_v2, %v909_v17  ;;  %vm446_vm4 = vcmp.eq.s32.totalorder %v1404_v4, %v909_v17 }
  0x34   :  { %1163 = vmatpush3.bf16.msk.msra.mxu1 %vm1160_vm1, %v1338_v11  ;;  %1149 = vmatprep.subr.msk.bf16.mxu0 %vm1451_vm2, %v1338_v11  ;;  %vm1477_vm9 = vmpackc.low %vm185_vm7, %vm184_vm6  ;;  %vm315_vm1 = vcmp.eq.s32.totalorder %v1401_v3, %v890_v16  ;;  %vm317_vm7 = vcmp.eq.s32.totalorder %v1407_v5, %v890_v16 }
  0x35   :  { %1165 = vmatprep.subr.msk.bf16.mxu1 %vm1455_vm3, %v1338_v11  ;;  %vm1495_vm14 = vmpackc.low %vm314_vm11, %vm313_vm10  ;;  %vm448_vm10 = vcmp.eq.s32.totalorder %v1410_v6, %v909_v17 }
  0x36   :  { %vm1499_vm15 = vmpackc.low %vm444_vm13, %vm443_vm12  ;;  %vm319_vm13 = vcmp.eq.s32.totalorder %v1435_v12, %v890_v16 }
  0x37   :  { %1151 = vmatpush3.bf16.msk.msra.mxu0 %vm1451_vm2, %v1338_v11  ;;  %vm316_vm2 = vcmp.eq.s32.totalorder %v1404_v4, %v890_v16 }
  0x38   :  { %1167 = vmatpush3.bf16.msk.msra.mxu1 %vm1455_vm3, %v1338_v11  ;;  %1153 = vmatprep.subr.msk.bf16.mxu0 %vm1152_vm8, %v1338_v11  ;;  %vm445_vm3 = vcmp.eq.s32.totalorder %v1401_v3, %v909_v17  ;;  %vm1519_vm5 = vmpackc.low %vm316_vm2, %vm315_vm1  ;;  %vm450_vm1 = vcmp.eq.s32.totalorder %v1438_v13, %v909_v17 }
  0x39   :  { %1169 = vmatprep.subr.msk.bf16.mxu1 %vm1477_vm9, %v1338_v11  ;;  %vm1524_vm6 = vmpackc.low %vm446_vm4, %vm445_vm3  ;;  %vm573_vm4 = vcmp.eq.s32.totalorder %v1395_v1, %v928_v27 }
  0x3b   :  { %1155 = vmatpush3.bf16.msk.msra.mxu0 %vm1152_vm8, %v1338_v11  ;;  %vm318_vm8 = vcmp.eq.s32.totalorder %v1410_v6, %v890_v16 }
  0x3c   :  { %1171 = vmatpush3.bf16.msk.msra.mxu1 %vm1477_vm9, %v1338_v11  ;;  %1173 = vmatprep.subr.msk.bf16.mxu0 %vm1495_vm14, %v1338_v11  ;;  %vm447_vm9 = vcmp.eq.s32.totalorder %v1407_v5, %v909_v17  ;;  %vm1546_vm11 = vmpackc.low %vm318_vm8, %vm317_vm7  ;;  %vm704_vm7 = vcmp.eq.s32.totalorder %v1398_v2, %v947_v28 }
  0x3d   :  { %1189 = vmatprep.subr.msk.bf16.mxu1 %vm1499_vm15, %v1338_v11  ;;  %vm1552_vm12 = vmpackc.low %vm448_vm10, %vm447_vm9  ;;  %vm575_vm10 = vcmp.eq.s32.totalorder %v1401_v3, %v928_v27 }
  0x3e   :  { %1043 = vmatmul.mubr.msk.f32.vlgmr.msra.gmra.mrb[0].mxu0 %vm91_vm0, %v50_v21 }
  0x3f   :  { %1062 = vmatmul.mubr.msk.f32.vlgmr.msra.gmra.mrb[0].mxu1 %vm91_vm0, %v1511_v22  ;;  %1175 = vmatpush3.bf16.msk.msra.mxu0 %vm1495_vm14, %v1338_v11  ;;  %vm320_vm14 = vcmp.eq.s32.totalorder %v1438_v13, %v890_v16 }
  0x40   :  { %1191 = vmatpush3.bf16.msk.msra.mxu1 %vm1499_vm15, %v1338_v11  ;;  %1177 = vmatprep.subr.msk.bf16.mxu0 %vm1519_vm5, %v1338_v11  ;;  %vm449_vm15 = vcmp.eq.s32.totalorder %v1435_v12, %v909_v17  ;;  %vm1184_vm2 = vmpackc.low %vm320_vm14, %vm319_vm13  ;;  %vm706_vm13 = vcmp.eq.s32.totalorder %v1404_v4, %v947_v28 }
  0x41   :  { %1193 = vmatprep.subr.msk.bf16.mxu1 %vm1524_vm6, %v1338_v11  ;;  %1080 = vmatprep.mubr.msk.f32.mxu0 %vm91_vm0, %v1423_v10  ;;  %vm1580_vm3 = vmpackc.low %vm450_vm1, %vm449_vm15  ;;  %vm577_vm1 = vcmp.eq.s32.totalorder %v1407_v5, %v928_v27 }
  0x42   :  { %1099 = vmatprep.mubr.msk.f32.mxu1 %vm91_vm0, %v1423_v10 }
  0x43   :  { %1179 = vmatpush3.bf16.msk.msra.mxu0 %vm1519_vm5, %v1338_v11  ;;  %vm574_vm5 = vcmp.eq.s32.totalorder %v1398_v2, %v928_v27 }
  0x44   :  { %1195 = vmatpush3.bf16.msk.msra.mxu1 %vm1524_vm6, %v1338_v11  ;;  %1181 = vmatprep.subr.msk.bf16.mxu0 %vm1546_vm11, %v1338_v11  ;;  %vm703_vm6 = vcmp.eq.s32.totalorder %v1395_v1, %v947_v28  ;;  %vm1598_vm8 = vmpackc.low %vm574_vm5, %vm573_vm4  ;;  %vm708_vm4 = vcmp.eq.s32.totalorder %v1410_v6, %v947_v28 }
  0x45   :  { %1197 = vmatprep.subr.msk.bf16.mxu1 %vm1552_vm12, %v1338_v11  ;;  %vm1602_vm9 = vmpackc.low %vm704_vm7, %vm703_vm6  ;;  %vm579_vm7 = vcmp.eq.s32.totalorder %v1435_v12, %v928_v27 }
  0x47   :  { %1183 = vmatpush3.bf16.msk.msra.mxu0 %vm1546_vm11, %v1338_v11  ;;  %vm576_vm11 = vcmp.eq.s32.totalorder %v1404_v4, %v928_v27 }
  0x48   :  { %1199 = vmatpush3.bf16.msk.msra.mxu1 %vm1552_vm12, %v1338_v11  ;;  %1185 = vmatprep.subr.msk.bf16.mxu0 %vm1184_vm2, %v1338_v11  ;;  %vm705_vm12 = vcmp.eq.s32.totalorder %v1401_v3, %v947_v28  ;;  %vm1620_vm14 = vmpackc.low %vm576_vm11, %vm575_vm10  ;;  %vm710_vm10 = vcmp.eq.s32.totalorder %v1438_v13, %v947_v28 }
  0x49   :  { %1201 = vmatprep.subr.msk.bf16.mxu1 %vm1580_vm3, %v1338_v11  ;;  %vm1626_vm15 = vmpackc.low %vm706_vm13, %vm705_vm12 }
  0x4b   :  { %1187 = vmatpush3.bf16.msk.msra.mxu0 %vm1184_vm2, %v1338_v11  ;;  %vm578_vm2 = vcmp.eq.s32.totalorder %v1410_v6, %v928_v27 }
  0x4c   :  { %1203 = vmatpush3.bf16.msk.msra.mxu1 %vm1580_vm3, %v1338_v11  ;;  %1205 = vmatprep.subr.msk.bf16.mxu0 %vm1598_vm8, %v1338_v11  ;;  %vm707_vm3 = vcmp.eq.s32.totalorder %v1407_v5, %v947_v28  ;;  %vm1212_vm5 = vmpackc.low %vm578_vm2, %vm577_vm1 }
  0x4d   :  { %1221 = vmatprep.subr.msk.bf16.mxu1 %vm1602_vm9, %v1338_v11  ;;  %vm1228_vm6 = vmpackc.low %vm708_vm4, %vm707_vm3 }
  0x4e   :  { %1081 = vmatmul.mubr.msk.f32.vlgmr.msra.gmra.mrb[2].mxu0 %vm91_vm0, %v1511_v22 }
  0x4f   :  { %1100 = vmatmul.mubr.msk.f32.vlgmr.msra.gmra.mrb[2].mxu1 %vm91_vm0, %v1511_v22  ;;  %1207 = vmatpush3.bf16.msk.msra.mxu0 %vm1598_vm8, %v1338_v11  ;;  %vm580_vm8 = vcmp.eq.s32.totalorder %v1438_v13, %v928_v27 }
  0x50   :  { %1223 = vmatpush3.bf16.msk.msra.mxu1 %vm1602_vm9, %v1338_v11  ;;  %1209 = vmatprep.subr.msk.bf16.mxu0 %vm1620_vm14, %v1338_v11  ;;  %vm709_vm9 = vcmp.eq.s32.totalorder %v1435_v12, %v947_v28  ;;  %vm1216_vm11 = vmpackc.low %vm580_vm8, %vm579_vm7 }
  0x51   :  { %1225 = vmatprep.subr.msk.bf16.mxu1 %vm1626_vm15, %v1338_v11  ;;  %1118 = vmatprep.mubr.msk.f32.mxu0 %vm91_vm0, %v1423_v10  ;;  %vm1232_vm12 = vmpackc.low %vm710_vm10, %vm709_vm9 }
  0x52   :  { %1137 = vmatprep.mubr.msk.f32.mxu1 %vm91_vm0, %v1423_v10 }
  0x53   :  { %1211 = vmatpush3.bf16.msk.msra.mxu0 %vm1620_vm14, %v1338_v11 }
  0x54   :  { %1227 = vmatpush3.bf16.msk.msra.mxu1 %vm1626_vm15, %v1338_v11  ;;  %1213 = vmatprep.subr.msk.bf16.mxu0 %vm1212_vm5, %v1338_v11 }
  0x55   :  { %1229 = vmatprep.subr.msk.bf16.mxu1 %vm1228_vm6, %v1338_v11 }
  0x57   :  { %1215 = vmatpush3.bf16.msk.msra.mxu0 %vm1212_vm5, %v1338_v11 }
  0x58   :  { %1231 = vmatpush3.bf16.msk.msra.mxu1 %vm1228_vm6, %v1338_v11  ;;  %1217 = vmatprep.subr.msk.bf16.mxu0 %vm1216_vm11, %v1338_v11 }
  0x59   :  { %1233 = vmatprep.subr.msk.bf16.mxu1 %vm1232_vm12, %v1338_v11 }
  0x5b   :  { %1219 = vmatpush3.bf16.msk.msra.mxu0 %vm1216_vm11, %v1338_v11 }
  0x5c   :  { %1235 = vmatpush3.bf16.msk.msra.mxu1 %vm1232_vm12, %v1338_v11 }
  0x5e   :  { %1119 = vmatmul.mubr.msk.f32.vlgmr.msra.gmra.mrb[4].mxu0 %vm91_vm0, %v1511_v22 }
  0x5f   :  { %1138 = vmatmul.mubr.msk.f32.vlgmr.msra.gmra.mrb[4].mxu1 %vm91_vm0, %v1511_v22 }
 0x111   :  { %v1044_v34 = vpop.f32.mrb[0].mxu0 }
 0x112   :  { %v1063_v35 = vpop.f32.mrb[0].mxu1  ;;  %v164_v36 = vpop.f32.mrb[1].mxu0 }
 0x113   :  { %v284_v37 = vmul.f32 %v1063_v35, %v1044_v34  ;;  %v274_v38 = vpop.f32.mrb[1].mxu1 }
 0x114   :  { %v283_v39 = vmul.f32 %v274_v38, %v164_v36 }
 0x116   :  { %v285_v40 = vadd.f32 %v284_v37, %v283_v39 }
 0x118   :  { %v286_v41 = vrot.slane %v285_v40, 4 }
 0x11a   :  { %v287_v42 = vadd.f32 %v286_v41, %v285_v40 }
 0x11c   :  { %v288_v43 = vrot.slane %v287_v42, 2 }
 0x11e   :  { %v289_v44 = vadd.f32 %v288_v43, %v287_v42 }
 0x120   :  { %v290_v45 = vrot.slane %v289_v44, 1 }
 0x121   :  { %v1082_v46 = vpop.f32.mrb[2].mxu0 }
 0x122   :  { %v1674_v47 = vadd.f32 %v290_v45, %v289_v44  ;;  %v413_v48 = vmul.f32 %v1082_v46, %v1044_v34  ;;  %v1101_v49 = vpop.f32.mrb[2].mxu1  ;;  %v403_v50 = vpop.f32.mrb[3].mxu0 }
 0x123   :  { %v543_v51 = vmul.f32 %v1101_v49, %v1044_v34  ;;  %v412_v52 = vmul.f32 %v403_v50, %v164_v36  ;;  %v533_v53 = vpop.f32.mrb[3].mxu1 }
 0x124   :  { %v293_v54 = vand.u32 2147483647, %v1674_v47  ;;  %v542_v55 = vmul.f32 %v533_v53, %v164_v36 }
 0x125   :  { %v414_v56 = vadd.f32 %v413_v48, %v412_v52 }
 0x126   :  { %v294_v57 = vsub.f32 0.0, %v293_v54  ;;  %v544_v58 = vadd.f32 %v543_v51, %v542_v55 }
 0x127   :  { %v415_v59 = vrot.slane %v414_v56, 4 }
 0x128   :  { %v545_v60 = vrot.slane %v544_v58, 4  ;;  %v295_v62 = vmul.f32 1.442695, %v294_v57 }
 0x129   :  { %v416_v61 = vadd.f32 %v415_v59, %v414_v56 }
 0x12a   :  { %v546_v63 = vadd.f32 %v545_v60, %v544_v58  ;;  %1242 = vpow2.f32 %v295_v62 }
 0x12b   :  { %v417_v1 = vrot.slane %v416_v61, 2 }
 0x12c   :  { %v547_v2 = vrot.slane %v546_v63, 2 }
 0x12d   :  { %v418_v3 = vadd.f32 %v417_v1, %v416_v61  ;;  %v292_v1 = vmin.f32 %v1674_v47, 0.0 }
 0x12e   :  { %v548_v4 = vadd.f32 %v547_v2, %v546_v63 }
 0x12f   :  { %v419_v5 = vrot.slane %v418_v3, 1 }
 0x130   :  { %v549_v6 = vrot.slane %v548_v4, 1 }
 0x131   :  { %v1677_v7 = vadd.f32 %v419_v5, %v418_v3  ;;  %v1120_v8 = vpop.f32.mrb[4].mxu0 }
 0x132   :  { %v1679_v9 = vadd.f32 %v549_v6, %v548_v4  ;;  %v673_v10 = vmul.f32 %v1120_v8, %v1044_v34  ;;  %v1139_v11 = vpop.f32.mrb[4].mxu1  ;;  %v663_v12 = vpop.f32.mrb[5].mxu0 }
 0x133   :  { %v421_v13 = vsub.f32 0.0, %v1677_v7  ;;  %v803_v14 = vmul.f32 %v1139_v11, %v1044_v34  ;;  %v672_v15 = vmul.f32 %v663_v12, %v164_v36  ;;  %v793_v16 = vpop.f32.mrb[5].mxu1 }
 0x134   :  { %v551_v17 = vsub.f32 0.0, %v1679_v9  ;;  %v802_v18 = vmul.f32 %v793_v16, %v164_v36  ;;  %v1243_v23 = vpop.eup %1242 }
 0x135   :  { %v423_v19 = vand.u32 2147483647, %v421_v13  ;;  %v674_v21 = vadd.f32 %v673_v10, %v672_v15  ;;  %v297_v31 = vadd.f32 1.0, %v1243_v23  ;;  %v300_v44 = vmul.f32 -0.5, %v1243_v23 }
 0x136   :  { %v553_v20 = vand.u32 2147483647, %v551_v17  ;;  %v804_v22 = vadd.f32 %v803_v14, %v802_v18  ;;  %v303_v56 = vand.u32 2147483647, %v1243_v23  ;;  %v422_v12 = vmin.f32 %v421_v13, 0.0 }
 0x137   :  { %v424_v24 = vsub.f32 0.0, %v423_v19  ;;  %v675_v26 = vrot.slane %v674_v21, 4  ;;  %v301_v54 = vadd.f32 1.0, %v300_v44  ;;  %v552_v18 = vmin.f32 %v551_v17, 0.0 }
 0x138   :  { %v554_v25 = vsub.f32 0.0, %v553_v20  ;;  %v805_v27 = vrot.slane %v804_v22, 4  ;;  %vm304_vm0 = vcmp.lt.f32.partialorder %v303_v56, 0.0004427343 }
 0x139   :  { %v425_v28 = vmul.f32 1.442695, %v424_v24  ;;  %v676_v30 = vadd.f32 %v675_v26, %v674_v21  ;;  %v302_v61 = vmul.f32 %v1243_v23, %v301_v54 }
 0x13a   :  { %v555_v29 = vmul.f32 1.442695, %v554_v25  ;;  %v806_v32 = vadd.f32 %v805_v27, %v804_v22 }
 0x13b   :  { %1244 = vpow2.f32 %v425_v28  ;;  %v677_v33 = vrot.slane %v676_v30, 2 }
 0x13c   :  { %1246 = vpow2.f32 %v555_v29  ;;  %v807_v34 = vrot.slane %v806_v32, 2 }
 0x13d   :  { %v678_v35 = vadd.f32 %v677_v33, %v676_v30  ;;  %1248 = vlog2.f32 %v297_v31 }
 0x13e   :  { %v808_v36 = vadd.f32 %v807_v34, %v806_v32 }
 0x13f   :  { %v679_v37 = vrot.slane %v678_v35, 1 }
 0x140   :  { %v809_v38 = vrot.slane %v808_v36, 1 }
 0x141   :  { %v1687_v39 = vadd.f32 %v679_v37, %v678_v35 }
 0x142   :  { %v1689_v40 = vadd.f32 %v809_v38, %v808_v36  ;;  %v829_v38 = vand.u32 127, %v53_v0 }
 0x143   :  { %v681_v41 = vsub.f32 0.0, %v1687_v39 }
 0x144   :  { %v811_v42 = vsub.f32 0.0, %v1689_v40  ;;  %vm833_vm2 = vcmp.lt.s32.totalorder %v829_v38, 16 }
 0x145   :  { %v1245_v43 = vpop.eup %1244  ;;  %v683_v45 = vand.u32 2147483647, %v681_v41  ;;  %v682_v34 = vmin.f32 %v681_v41, 0.0 }
 0x146   :  { %v1247_v46 = vpop.eup %1246  ;;  %v813_v48 = vand.u32 2147483647, %v811_v42  ;;  %v427_v49 = vadd.f32 1.0, %v1245_v43  ;;  %v430_v59 = vmul.f32 -0.5, %v1245_v43  ;;  %v433_v2 = vand.u32 2147483647, %v1245_v43 }
 0x147   :  { %v684_v50 = vsub.f32 0.0, %v683_v45  ;;  %v557_v51 = vadd.f32 1.0, %v1247_v46  ;;  %v1249_v52 = vpop.eup %1248  ;;  %v560_v60 = vmul.f32 -0.5, %v1247_v46  ;;  %v563_v4 = vand.u32 2147483647, %v1247_v46 }
 0x148   :  { %v814_v53 = vsub.f32 0.0, %v813_v48  ;;  %1250 = vlog2.f32 %v427_v49  ;;  %v299_v58 = vmul.f32 0.6931472, %v1249_v52  ;;  %v431_v63 = vadd.f32 1.0, %v430_v59 }
 0x149   :  { %v685_v55 = vmul.f32 1.442695, %v684_v50  ;;  %1252 = vlog2.f32 %v557_v51  ;;  %v561_v3 = vadd.f32 1.0, %v560_v60  ;;  %vm434_vm13 = vcmp.lt.f32.partialorder %v433_v2, 0.0004427343 }
 0x14a   :  { %v815_v57 = vmul.f32 1.442695, %v814_v53  ;;  %v305_v62 = vsel %vm304_vm0, %v302_v61, %v299_v58  ;;  %v432_v11 = vmul.f32 %v1245_v43, %v431_v63  ;;  %vm564_vm14 = vcmp.lt.f32.partialorder %v563_v4, 0.0004427343 }
 0x14b   :  { %1254 = vpow2.f32 %v685_v55  ;;  %v306_v6 = vsub.f32 %v292_v1, %v305_v62  ;;  %v562_v15 = vmul.f32 %v1247_v46, %v561_v3  ;;  %v812_v44 = vmin.f32 %v811_v42, 0.0 }
 0x14c   :  { %1256 = vpow2.f32 %v815_v57 }
 0x14d   :  { %v307_v20 = vsub.f32 0.0, %v306_v6 }
 0x152   :  { %v1251_v5 = vpop.eup %1250 }
 0x153   :  { %v1253_v8 = vpop.eup %1252  ;;  %v429_v10 = vmul.f32 0.6931472, %v1251_v5 }
 0x154   :  { %v559_v14 = vmul.f32 0.6931472, %v1253_v8 }
 0x155   :  { %v1255_v16 = vpop.eup %1254  ;;  %v435_v19 = vsel %vm434_vm13, %v432_v11, %v429_v10 }
 0x156   :  { %v1257_v47 = vpop.eup %1256  ;;  %v436_v21 = vsub.f32 %v422_v12, %v435_v19  ;;  %v565_v22 = vsel %vm564_vm14, %v562_v15, %v559_v14  ;;  %v687_v23 = vadd.f32 1.0, %v1255_v16  ;;  %v690_v13 = vmul.f32 -0.5, %v1255_v16 }
 0x157   :  { %v817_v24 = vadd.f32 1.0, %v1257_v47  ;;  %v566_v26 = vsub.f32 %v552_v18, %v565_v22  ;;  %v820_v27 = vmul.f32 -0.5, %v1257_v47  ;;  %v693_v29 = vand.u32 2147483647, %v1255_v16 }
 0x158   :  { %v437_v25 = vsub.f32 %v307_v20, %v436_v21  ;;  %1258 = vlog2.f32 %v687_v23  ;;  %v691_v28 = vadd.f32 1.0, %v690_v13  ;;  %v823_v9 = vand.u32 2147483647, %v1257_v47 }
 0x159   :  { %1260 = vlog2.f32 %v817_v24  ;;  %v821_v30 = vadd.f32 1.0, %v820_v27  ;;  %vm694_vm15 = vcmp.lt.f32.partialorder %v693_v29, 0.0004427343 }
 0x15a   :  { %v567_v7 = vsub.f32 %v437_v25, %v566_v26  ;;  %v692_v33 = vmul.f32 %v1255_v16, %v691_v28  ;;  %vm824_vm1 = vcmp.lt.f32.partialorder %v823_v9, 0.0004427343 }
 0x15b   :  { %v822_v36 = vmul.f32 %v1257_v47, %v821_v30 }
 0x162   :  { %v1259_v17 = vpop.eup %1258 }
 0x163   :  { %v1261_v31 = vpop.eup %1260  ;;  %v689_v32 = vmul.f32 0.6931472, %v1259_v17 }
 0x164   :  { %v819_v35 = vmul.f32 0.6931472, %v1261_v31 }
 0x165   :  { %v695_v37 = vsel %vm694_vm15, %v692_v33, %v689_v32 }
 0x166   :  { %v696_v43 = vsub.f32 %v682_v34, %v695_v37  ;;  %v825_v45 = vsel %vm824_vm1, %v822_v36, %v819_v35 }
 0x167   :  { %v826_v48 = vsub.f32 %v812_v44, %v825_v45 }
 0x168   :  { %v697_v46 = vsub.f32 %v567_v7, %v696_v43 }
 0x16a   :  { %v827_v49 = vsub.f32 %v697_v46, %v826_v48 }
 0x16c   :  { %v834_v39 = vsel %vm833_vm2, %v827_v49, 0.0 }
 0x16d   :  { %835 = vst [vmem:[#allocation7] sm:$0x1] %v834_v39 }
 0x16e   :  { %1317 = shalt.err (!%p1314_p6)
}
 0x16f   :  { %s1318_s7 = scalar_lea.hbm %s1724_s5, 16 }
 0x170   :  { %p1319_p7 = scmp.ne.s32.totalorder %s1724_s5, %s1318_s7  ;;  %p1322_p8 = scmp.lt.u32.totalorder %s1318_s7, %s1724_s5 }
 0x172   :  { %p1324_p9 = pnand %p1322_p8, %p1319_p7 }
 0x174   :  { %1327 = shalt.err (!%p1324_p9)
}
 0x175   :  { %845 = dma.vmem_to_hbm [thread:$0]  %s843_s27, 16, %s1724_s5, [#allocation4]  }
 0x176   :  { %1332 = dma.done.wait [#allocation4], 16  }
 0x177   :  { %1333 = vsyncadd [#allocation4], 4294967280 }
 0x178   :  { %849 = vsyncpa [#allocation3], 1 }
 0x179   :  { %850 = vsyncpa [#allocation6], 1 }
 0x17a   :  { %851 = vsyncpa [#allocation4], 1 }

</bundles_post_ra>
